<compile_context>
chip_gen: v5e
topology: v5e:2x2
jax: 0.10.0
libtpu: 0.0.40
codegen_flags: <defaults>
</compile_context>

<pallas_src>
import jax
import jax.numpy as jnp
from jax.experimental import pallas as pl
from jax.experimental.pallas import tpu as pltpu


def _round_up(x: int, m: int) -> int:
    return (x + m - 1) // m * m


def _sublane(dtype) -> int:
    # second-to-last block dim should be a multiple of the sublane packing
    itemsize = jnp.dtype(dtype).itemsize
    return max(8, 32 // itemsize)  # 8 for f32, 16 for bf16, 32 for int8/fp8


def _vmem_capacity_bytes() -> int:
    try:
        info = pltpu.get_tpu_info()
        cap = getattr(info, "vmem_capacity_bytes", None)
        if cap:
            return int(cap)
    except Exception:
        pass
    return 64 << 20  # conservative (v7x-sized) fallback


def _pick_tile_h(B: int, C: int, Wp: int, Wo: int, H: int, dtype,
                 budget_bytes: int) -> int:
    """Largest sublane-aligned H-tile whose double-buffered working set fits."""
    sub = _sublane(dtype)
    itemsize = jnp.dtype(dtype).itemsize
    # per H row, double-buffered: inputs 2 bufs * 2 arrays * C * Wp
    #                             outputs 2 bufs * 2C * Wo
    per_row = (4 * C * Wp + 4 * C * Wo) * itemsize
    th = max(sub, (budget_bytes // per_row) // sub * sub)
    th = min(th, _round_up(H, sub))
    # v7x has 2 TensorCores sharing HBM; make sure the "parallel" part of the
    # grid has >= 2 steps so one core is not idle for batch-1 inputs.
    if B * pl.cdiv(H, th) < 2 and H > sub:
        th = _round_up(-(-H // 2), sub)
    return th


def _matchshifted_kernel(shifts_ref, left_ref, right_ref, out_ref):
    # shifts_ref           : (D,) int32 in SMEM (scalar prefetch)
    # left_ref / right_ref : (1, C, TH, Wp) VMEM tiles (resident across D)
    # out_ref              : (1, 2C, TH, Wo) VMEM tile (D dim squeezed away)
    d = pl.program_id(2)
    shift = shifts_ref[d]
    _, C, _, Wp = left_ref.shape
    Wo = out_ref.shape[-1]

    left = left_ref[...]
    right = right_ref[...]

    # lane-index mask, built at (1,1,1,Wp) and broadcast by jnp.where
    w_idx = jax.lax.broadcasted_iota(jnp.int32, (1, 1, 1, Wp), dimension=3)
    keep = w_idx >= shift
    zero = jnp.zeros((), left.dtype)

    # shifted_left[..., w]  = left[..., w]           for w >= shift, else 0
    shifted_left = jnp.where(keep, left, zero)
    # shifted_right[..., w] = right[..., w - shift]  for w >= shift, else 0
    # circular lane roll (XLU, dynamic shift); wrapped prefix masked to 0.
    shifted_right = jnp.where(keep, pltpu.roll(right, shift=shift, axis=3), zero)

    out_ref[:, :C] = shifted_left[..., :Wo]
    out_ref[:, C:] = shifted_right[..., :Wo]


def matchshifted_volume(left: jax.Array, right: jax.Array, shifts) -> jax.Array:
    """Fused PSMNet cost-volume slab: returns (B, 2C, D, H, W)."""
    assert left.shape == right.shape and left.dtype == right.dtype
    B, C, H, W = left.shape
    shifts = jnp.asarray(shifts, jnp.int32).reshape(-1)
    D = int(shifts.shape[0])

    dtype = left.dtype
    itemsize = jnp.dtype(dtype).itemsize

    # Pad inputs once to a 128-lane multiple so the in-kernel roll is
    # lane-aligned (amortized over all D disparities). Output is written at
    # the true width W, so there is no post-slice HBM pass.
    # TODO(synk): drop the input pad too (unaligned roll) once Mosaic handles
    # dynamic lane rotates on non-128-multiple widths everywhere.
    Wp = _round_up(max(W, 128), 128)
    if Wp != W:
        pad = ((0, 0), (0, 0), (0, 0), (0, Wp - W))
        left_p = jnp.pad(left, pad)
        right_p = jnp.pad(right, pad)
    else:
        left_p, right_p = left, right

    cap = _vmem_capacity_bytes()
    budget = min(cap // 4, 28 << 20)                       # v7x: 16 MiB, v5e/v6e: 28 MiB
    vmem_limit = min(max(cap // 2, budget + (8 << 20)), 64 << 20)

    TH = _pick_tile_h(B, C, Wp, W, H, dtype, budget)
    grid = (B, pl.cdiv(H, TH), D)

    cost = pl.CostEstimate(
        flops=2 * B * 2 * C * D * H * W,                   # ~1 select per output element
        transcendentals=0,
        bytes_accessed=(2 * B * C * H * Wp                 # inputs read once
                        + 2 * B * C * D * H * W) * itemsize,  # outputs written once
    )

    out = pl.pallas_call(
        _matchshifted_kernel,
        out_shape=jax.ShapeDtypeStruct((B, 2 * C, D, H, W), dtype),
        grid_spec=pltpu.PrefetchScalarGridSpec(
            num_scalar_prefetch=1,
            grid=grid,
            in_specs=[
                pl.BlockSpec((1, C, TH, Wp), lambda b, h, d, *_: (b, 0, h, 0)),
                pl.BlockSpec((1, C, TH, Wp), lambda b, h, d, *_: (b, 0, h, 0)),
            ],
            out_specs=pl.BlockSpec(
                (1, 2 * C, None, TH, W), lambda b, h, d, *_: (b, 0, d, h, 0)
            ),
        ),
        compiler_params=pltpu.CompilerParams(
            dimension_semantics=("parallel", "parallel", "arbitrary"),
            vmem_limit_bytes=vmem_limit,
        ),
        cost_estimate=cost,
    )(shifts, left_p, right_p)
    return out


def matchshifted(left: jax.Array, right: jax.Array, shift: int) -> jax.Array:
    """Pallas equivalent of PSMNet matchshifted.forward (NCHW inputs)."""
    B, C, H, W = left.shape
    assert 0 <= shift <= W
    # Original module output shape (B, 2C, 1, H, W) == D=1 cost-volume slab.
    return matchshifted_volume(left, right, (shift,))


def _matchshifted_ref(left, right, shift):
    B, C, H, W = left.shape
    sl = jnp.pad(left[:, :, :, shift:], ((0, 0), (0, 0), (0, 0), (shift, 0)))
    sr = jnp.pad(right[:, :, :, : W - shift], ((0, 0), (0, 0), (0, 0), (shift, 0)))
    return jnp.concatenate([sl, sr], axis=1).reshape(B, 2 * C, 1, H, W)


def _volume_ref(left, right, shifts):
    return jnp.concatenate(
        [_matchshifted_ref(left, right, int(s)) for s in shifts], axis=2
    )


if __name__ == "__main__":
    key = jax.random.PRNGKey(0)
    k1, k2 = jax.random.split(key)
    B, C, H, W = 2, 4, 16, 16

    left = jax.random.normal(k1, (B, C, H, W), dtype=jnp.float32)
    right = jax.random.normal(k2, (B, C, H, W), dtype=jnp.float32)

    # Original module semantics: single shift -> (B, 2C, 1, H, W).
    # All three shifts reuse the SAME compiled kernel (shift is runtime data).
    for s in (0, 3, W):
        out = jax.block_until_ready(matchshifted(left, right, s))
        ref = _matchshifted_ref(left, right, s)
        assert out.shape == (B, 2 * C, 1, H, W)
        assert jnp.allclose(out, ref, atol=1e-6, rtol=1e-6), f"shift={s}"

    # Fused cost-volume path: all disparities in a single pallas_call.
    shifts = (0, 1, 3, 7)
    vol = jax.block_until_ready(matchshifted_volume(left, right, shifts))
    vref = _volume_ref(left, right, shifts)
    assert vol.shape == (B, 2 * C, len(shifts), H, W)
    assert jnp.allclose(vol, vref, atol=1e-6, rtol=1e-6)

    print("KERNEL_OK")
</pallas_src>

<mosaic_0001>
module attributes {stable_mosaic.version = 11 : i64} {
  func.func @_matchshifted_kernel(%arg0: i32, %arg1: i32, %arg2: i32, %arg3: memref<1xi32, #tpu.memory_space<smem>>, %arg4: memref<1x4x16x128xf32, #tpu.memory_space<vmem>>, %arg5: memref<1x4x16x128xf32, #tpu.memory_space<vmem>>, %arg6: memref<1x8x1x16x16xf32, #tpu.memory_space<vmem>>) attributes {dimension_semantics = [#tpu.dimension_semantics<parallel>, #tpu.dimension_semantics<parallel>, #tpu.dimension_semantics<arbitrary>], iteration_bounds = array<i64: 2, 1, 1>, scalar_prefetch = 1 : i64, scratch_operands = 0 : i64, tpu.core_type = #tpu.core_type<tc>, window_params = [{transform_indices = @transform_0, window_bounds = array<i64: 1, 4, 16, 128>}, {transform_indices = @transform_1, window_bounds = array<i64: 1, 4, 16, 128>}, {transform_indices = @transform_2, window_bounds = array<i64: 1, 8, 1, 16, 16>}]} {
    %0 = arith.index_cast %arg2 : i32 to index
    %1 = memref.load %arg3[%0] : memref<1xi32, #tpu.memory_space<smem>>
    %c0 = arith.constant 0 : index
    %c0_0 = arith.constant 0 : index
    %c0_1 = arith.constant 0 : index
    %c0_2 = arith.constant 0 : index
    %2 = vector.load %arg4[%c0, %c0_0, %c0_1, %c0_2] : memref<1x4x16x128xf32, #tpu.memory_space<vmem>>, vector<1x4x16x128xf32>
    %c0_3 = arith.constant 0 : index
    %c0_4 = arith.constant 0 : index
    %c0_5 = arith.constant 0 : index
    %c0_6 = arith.constant 0 : index
    %3 = vector.load %arg5[%c0_3, %c0_4, %c0_5, %c0_6] : memref<1x4x16x128xf32, #tpu.memory_space<vmem>>, vector<1x4x16x128xf32>
    %4 = tpu.iota {dimensions = array<i32: 3>} : vector<1x1x1x128xi32>
    %5 = vector.broadcast %1 : i32 to vector<1x1x1x128xi32>
    %6 = arith.cmpi sge, %4, %5 : vector<1x1x1x128xi32>
    %cst = arith.constant 0.000000e+00 : f32
    %7 = vector.shape_cast %6 : vector<1x1x1x128xi1> to vector<1x1x1x128xi1>
    %8 = vector.broadcast %7 : vector<1x1x1x128xi1> to vector<1x4x16x128xi1>
    %9 = vector.broadcast %cst : f32 to vector<1x4x16x128xf32>
    %10 = arith.select %8, %2, %9 : vector<1x4x16x128xi1>, vector<1x4x16x128xf32>
    %11 = tpu.dynamic_rotate %3 by %1 dim 3 : vector<1x4x16x128xf32>, i32 -> vector<1x4x16x128xf32>
    %cst_7 = arith.constant 0.000000e+00 : f32
    %12 = vector.shape_cast %6 : vector<1x1x1x128xi1> to vector<1x1x1x128xi1>
    %13 = vector.broadcast %12 : vector<1x1x1x128xi1> to vector<1x4x16x128xi1>
    %14 = vector.broadcast %cst_7 : f32 to vector<1x4x16x128xf32>
    %15 = arith.select %13, %11, %14 : vector<1x4x16x128xi1>, vector<1x4x16x128xf32>
    %16 = vector.extract_strided_slice %10 {offsets = [0, 0, 0, 0], sizes = [1, 4, 16, 16], strides = [1, 1, 1, 1]} : vector<1x4x16x128xf32> to vector<1x4x16x16xf32>
    %c0_8 = arith.constant 0 : index
    %c0_9 = arith.constant 0 : index
    %c0_10 = arith.constant 0 : index
    %c0_11 = arith.constant 0 : index
    %c0_12 = arith.constant 0 : index
    %17 = vector.load %arg6[%c0_8, %c0_9, %c0_10, %c0_11, %c0_12] : memref<1x8x1x16x16xf32, #tpu.memory_space<vmem>>, vector<1x4x1x16x16xf32>
    %18 = vector.shape_cast %17 : vector<1x4x1x16x16xf32> to vector<1x4x16x16xf32>
    %19 = vector.shape_cast %16 : vector<1x4x16x16xf32> to vector<1x4x1x16x16xf32>
    tpu.vector_store %arg6[%c0_8, %c0_9, %c0_10, %c0_11, %c0_12], %19 {strides = array<i32>} : memref<1x8x1x16x16xf32, #tpu.memory_space<vmem>>, vector<1x4x1x16x16xf32>,
    %20 = vector.extract_strided_slice %15 {offsets = [0, 0, 0, 0], sizes = [1, 4, 16, 16], strides = [1, 1, 1, 1]} : vector<1x4x16x128xf32> to vector<1x4x16x16xf32>
    %c0_13 = arith.constant 0 : index
    %c4 = arith.constant 4 : index
    %c0_14 = arith.constant 0 : index
    %c0_15 = arith.constant 0 : index
    %c0_16 = arith.constant 0 : index
    %21 = vector.load %arg6[%c0_13, %c4, %c0_14, %c0_15, %c0_16] : memref<1x8x1x16x16xf32, #tpu.memory_space<vmem>>, vector<1x4x1x16x16xf32>
    %22 = vector.shape_cast %21 : vector<1x4x1x16x16xf32> to vector<1x4x16x16xf32>
    %23 = vector.shape_cast %20 : vector<1x4x16x16xf32> to vector<1x4x1x16x16xf32>
    tpu.vector_store %arg6[%c0_13, %c4, %c0_14, %c0_15, %c0_16], %23 {strides = array<i32>} : memref<1x8x1x16x16xf32, #tpu.memory_space<vmem>>, vector<1x4x1x16x16xf32>,
    return
  }
  func.func @transform_0(%arg0: i32, %arg1: i32, %arg2: i32, %arg3: memref<1xi32, #tpu.memory_space<smem>>) -> (i32, i32, i32, i32) {
    %c0_i32 = arith.constant 0 : i32
    %c0_i32_0 = arith.constant 0 : i32
    %c0_i32_1 = arith.constant 0 : i32
    return %arg0, %c0_i32, %arg1, %c0_i32_0 : i32, i32, i32, i32
  }
  func.func @transform_1(%arg0: i32, %arg1: i32, %arg2: i32, %arg3: memref<1xi32, #tpu.memory_space<smem>>) -> (i32, i32, i32, i32) {
    %c0_i32 = arith.constant 0 : i32
    %c0_i32_0 = arith.constant 0 : i32
    %c0_i32_1 = arith.constant 0 : i32
    return %arg0, %c0_i32, %arg1, %c0_i32_0 : i32, i32, i32, i32
  }
  func.func @transform_2(%arg0: i32, %arg1: i32, %arg2: i32, %arg3: memref<1xi32, #tpu.memory_space<smem>>) -> (i32, i32, i32, i32, i32) {
    %c0_i32 = arith.constant 0 : i32
    %c0_i32_0 = arith.constant 0 : i32
    %c0_i32_1 = arith.constant 0 : i32
    return %arg0, %c0_i32, %arg2, %arg1, %c0_i32_0 : i32, i32, i32, i32, i32
  }
}

</mosaic_0001>

<bundles_post_ra>
// kernel: tpu_custom_call.1
= control target key start
LH: loop header
LB: loop body
LE: loop exit
PB: predicated region body
PF: predicated region fallthrough
CT: control target
= control target key end

     0   :  { %s974_s0 = inlined_call_operand.<no memory space> [shape: s32[1], index: 0, kind: input, shape index: {}]   ;;  %s975_s1 = inlined_call_operand.hbm [shape: f32[2,4,16,128], index: 1, kind: input, shape index: {}]   ;;  %s976_s2 = inlined_call_operand.hbm [shape: f32[2,4,16,128], index: 2, kind: input, shape index: {}]   ;;  %s977_s3 = inlined_call_operand.hbm [shape: f32[2,8,1,16,16], index: 3, kind: output, shape index: {}]  }
   0x1   :  { %8 = sst [smem:[#allocation3]] %s974_s0 }
   0x2   :  { %9 = vsyncpa [#allocation5], 0 }
   0x3   :  { %11 = vsyncpa [#allocation5 + $0x1], 0 }
   0x4   :  { %12 = vsyncpa [#allocation8], 0 }
   0x5   :  { %14 = vsyncpa [#allocation8 + $0x1], 0 }
   0x6   :  { %15 = vsyncpa [#allocation6], 0 }
   0x7   :  { %17 = vsyncpa [#allocation6 + $0x1], 0  ;;  %s731_s14 = smov 0   ;;  %s733_s15 = smov 0  }
   0x8   :  { %s735_s16 = smov 0   ;;  %s737_s17 = smov 0  }
   0x9   :  { %s739_s18 = smov 0   ;;  %s741_s19 = smov 0  }
   0xa LB: > { %s455_s0 = sadd.s32 4294967295, %s702_s19   ;;  %s456_s20 = sadd.s32 4294967294, %s702_s19   ;;  %s702_s19 = sphi %s741_s19, %s23_s19   ;;  %s698_s18 = sphi %s739_s18, %s989_s18   ;;  %s694_s17 = sphi %s737_s17, %s988_s17   ;;  %s690_s16 = sphi %s735_s16, %s987_s16   ;;  %s686_s15 = sphi %s733_s15, %s986_s15   ;;  %s682_s14 = sphi %s731_s14, %s985_s14  }
   0xb   : > { %s42_s21 = sadd.s32 1, %s698_s18  ;;  %s51_s22 = sadd.s32 1, %s690_s16 }
   0xc   : > { %p44_p0 = scmp.ge.s32.totalorder %s42_s21, 2  ;;  %p58_p1 = scmp.ne.s32.totalorder %s690_s16, %s686_s15 }
   0xd   : > { %p59_p2 = scmp.eq.s32.totalorder %s702_s19, 0  ;;  %p64_p3 = scmp.ne.s32.totalorder %s686_s15, %s682_s14 }
   0xe   : > { %s991_s21 = smov (%p44_p0, %s42_s21), 0  ;;  %p65_p5 = scmp.eq.s32.totalorder %s455_s0, 0 }
   0xf   : > { %p772_p4 = por %p59_p2, %p58_p1  ;;  %s46_s24 = ssub.s32 %s698_s18, %s991_s21 }
  0x10   : > { %p120_p6 = scmp.eq.s32.totalorder %s455_s0, 1  ;;  %p49_p7 = scmp.eq.s32.totalorder %s46_s24, 0 }
  0x11   : > { %p778_p8 = por %p65_p5, %p64_p3  ;;  %p126_p10 = scmp.eq.s32.totalorder %s456_s20, 1 }
  0x12   : > { %p782_p9 = por %p120_p6, %p58_p1  ;;  %p458_p12 = scmp.ge.s32.totalorder %s702_s19, 2 }
  0x13   : > { %s787_s27 = scalar_select %p49_p7, %s690_s16, %s51_s22  }
  0x14   : > { %p789_p11 = por %p126_p10, %p64_p3  ;;  %p502_p13 = scmp.lt.s32.totalorder %s702_s19, 2 }
  0x15   : > { %s796_s29 = sand.u32 1, %s690_s16   ;;  %s482_s4 = sshll.u32 %s698_s18, 6 }
  0x16   : > { %s459_s30 = sshll.u32 %s796_s29, 6  ;;  %s157_s7 = scalar_lea.hbm %s975_s1, %s482_s4 }
  0x17   : > { %s150_s8 = scalar_lea.vmem [#allocation4], %s459_s30  ;;  %s158_s10 = sshll.u32 %s157_s7, 4  ;;  %s159_s10 = int_to_ptr.hbm [resolvable:$true] %s158_s10 }
  0x18   : > { %s160_s9 = sshll.u32 %s150_s8, 4  ;;  %p805_p0 = pnand %p502_p13, %p772_p4  ;;  %s161_s9 = int_to_ptr.vmem [resolvable:$true] %s160_s9 }
  0x19   : > { %p465_p1 = scmp.ge.s32.totalorder %s702_s19, 1  ;;  %s147_s12 = scalar_lea.sflag [#allocation5], %s796_s29 }
  0x1a   : > { %s704_s13 = smov 128   ;;  %s705_s0 = smov 8  }
  0x1b   : > { %494 = dma.hbm_to_vmem [thread:$0]  (!%p805_p0), %s159_s10, 1024, %s161_s9, %s147_s12, %s704_s13, %s704_s13, %s705_s0  }
  0x1c   : > { %p192_p2 = scmp.lt.s32.totalorder %s702_s19, 3  ;;  %s181_s24 = scalar_lea.hbm %s976_s2, %s482_s4 }
  0x1d   : > { %s182_s5 = sshll.u32 %s181_s24, 4  ;;  %s174_s23 = scalar_lea.vmem [#allocation7], %s459_s30  ;;  %s183_s5 = int_to_ptr.hbm [resolvable:$true] %s182_s5 }
  0x1e   : > { %p193_p3 = pnand %p465_p1, %p192_p2  ;;  %s184_s6 = sshll.u32 %s174_s23, 4  ;;  %s185_s6 = int_to_ptr.vmem [resolvable:$true] %s184_s6 }
  0x1f   : > { %s171_s7 = scalar_lea.sflag [#allocation8], %s796_s29  ;;  %s821_s8 = sand.u32 (!%p193_p3), 1, %s686_s15  }
  0x20   : > { %497 = dma.hbm_to_vmem [thread:$0]  (!%p805_p0), %s183_s5, 1024, %s185_s6, %s171_s7, %s704_s13, %s704_s13, %s705_s0  }
  0x21   : > { %196 = sbr.rel (%p193_p3) target bundleno = 185 (0xb9), region = 28  ;;  %s466_s9 = sshll.u32 (!%p193_p3), %s821_s8, 6 }
  0x22   : > { %s199_s10 = scalar_lea.sflag (!%p193_p3), [#allocation5], %s821_s8  ;;  %s825_s12 = scalar_lea.vmem (!%p193_p3), [#allocation4], %s466_s9 }
  0x26   : > { %669 = dma.done.wait (%p778_p8), %s199_s10, 1024  }
  0x27   : > { %671 = vsyncadd (%p778_p8), %s199_s10, 4294966272  ;;  %s209_s29 = scalar_lea.sflag [#allocation8], %s821_s8  ;;  %s832_s30 = scalar_lea.vmem [#allocation7], %s466_s9 }
  0x28   : > { %673 = dma.done.wait (%p778_p8), %s209_s29, 1024  }
  0x29   : > { %675 = vsyncadd (%p778_p8), %s209_s29, 4294966272  ;;  %v259_v0 = vlaneseq  ;;  %s242_s4 = sld [smem:[#allocation3]]  ;;  %v243_v2 = vld [vmem:[%s825_s12] sm:$0xff]  ;;  %v244_v3 = vld [vmem:[%s825_s12 + $0x8] sm:$0xff]  ;;  %s468_s25 = sshll.u32 %s821_s8, 7  ;;  %vm299_vm1 = vcmask 130048  }
  0x2a   : > { %v245_v5 = vld [vmem:[%s825_s12 + $0x10] sm:$0xff]  ;;  %v246_v7 = vld [vmem:[%s825_s12 + $0x18] sm:$0xff]  ;;  %v247_v10 = vld [vmem:[%s825_s12 + $0x20] sm:$0xff]  ;;  %s865_s13 = scalar_lea.vmem [#allocation9], %s468_s25  ;;  %s484_s0 = sshll.u32 %s694_s17, 7 }
  0x2b   : > { %v260_v1 = vand.u32 127, %v259_v0  ;;  %v253_v8 = vld [vmem:[%s832_s30 + $0x10] sm:$0xff]  ;;  %v251_v12 = vld [vmem:[%s832_s30] sm:$0xff]  ;;  %v248_v13 = vld [vmem:[%s825_s12 + $0x28] sm:$0xff]  ;;  %s333_s24 = scalar_lea.hbm %s977_s3, %s484_s0  ;;  %s334_s17 = sshll.u32 %s865_s13, 4  ;;  %s335_s17 = int_to_ptr.vmem [resolvable:$true] %s334_s17 }
  0x2c   : > { %v249_v15 = vld [vmem:[%s825_s12 + $0x30] sm:$0xff]  ;;  %v255_v17 = vld [vmem:[%s832_s30 + $0x20] sm:$0xff]  ;;  %v250_v18 = vld [vmem:[%s825_s12 + $0x38] sm:$0xff]  ;;  %s336_s5 = sshll.u32 %s333_s24, 4  ;;  %s318_s23 = scalar_lea.sflag [#allocation6], %s821_s8  ;;  %s337_s5 = int_to_ptr.hbm [resolvable:$true] %s336_s5 }
  0x2d   : > { %v254_v22 = vld [vmem:[%s832_s30 + $0x18] sm:$0xff]  ;;  %v252_v24 = vld [vmem:[%s832_s30 + $0x8] sm:$0xff]  ;;  %v257_v27 = vld [vmem:[%s832_s30 + $0x30] sm:$0xff]  ;;  %s630_s6 = sshra.s32 %s337_s5, 4  ;;  %s636_s12 = scalar_lea.hbm %s977_s3, 256  ;;  %s631_s6 = int_to_ptr.hbm [resolvable:$true] %s630_s6 }
  0x2e   : > { %v256_v25 = vld [vmem:[%s832_s30 + $0x28] sm:$0xff]  ;;  %v258_v26 = vld [vmem:[%s832_s30 + $0x38] sm:$0xff]  ;;  %s632_s7 = scalar_lea.hbm %s631_s6, 128  ;;  %p637_p7 = scmp.lt.s32.totalorder %s631_s6, %s977_s3 }
  0x2f   : > { %s840_s11 = sand.u32 127, %s242_s4   ;;  %v261_v4 = vstv %s242_s4  ;;  %p633_p4 = scmp.ne.s32.totalorder %s631_s6, %s632_s7 }
  0x30   : > { %vm843_vm0 = vcmp.ge.s32.totalorder %v260_v1, %v261_v4  ;;  %279 = vrot.lane.b32.xlu1 %v253_v8, %s840_s11  ;;  %275 = vrot.lane.b32.xlu0 %v251_v12, %s840_s11  ;;  %p638_p8 = scmp.lt.s32.totalorder %s636_s12, %s632_s7 }
  0x31   : > { %v265_v9 = vsel %vm843_vm0, %v243_v2, 0.0  ;;  %v266_v11 = vsel %vm843_vm0, %v244_v3, 0.0  ;;  %v267_v14 = vsel %vm843_vm0, %v245_v5, 0.0  ;;  %v268_v16 = vsel %vm843_vm0, %v246_v7, 0.0  ;;  %283 = vrot.lane.b32.xlu2 %v255_v17, %s840_s11  ;;  %p634_p5 = pnand %p633_p4, %p782_p9 }
  0x32   : > { %300 = vst.msk [vmem:[%s865_s13] sm:$0xff] %vm299_vm1, %v265_v9  ;;  %v269_v19 = vsel %vm843_vm0, %v247_v10, 0.0  ;;  %v270_v20 = vsel %vm843_vm0, %v248_v13, 0.0  ;;  %v271_v21 = vsel %vm843_vm0, %v249_v15, 0.0  ;;  %v272_v23 = vsel %vm843_vm0, %v250_v18, 0.0  ;;  %p639_p10 = por %p638_p8, %p637_p7 }
  0x33   : > { %301 = vst.msk [vmem:[%s865_s13 + $0x8] sm:$0xff] %vm299_vm1, %v266_v11  ;;  %p635_p6 = pneg %p634_p5 }
  0x34   : > { %302 = vst.msk [vmem:[%s865_s13 + $0x10] sm:$0xff] %vm299_vm1, %v267_v14 }
  0x35   : > { %303 = vst.msk [vmem:[%s865_s13 + $0x18] sm:$0xff] %vm299_vm1, %v268_v16  ;;  %p640_p13 = pnand %p639_p10, %p635_p6 }
  0x36   : > { %304 = vst.msk [vmem:[%s865_s13 + $0x20] sm:$0xff] %vm299_vm1, %v269_v19 }
  0x37   : > { %305 = vst.msk [vmem:[%s865_s13 + $0x28] sm:$0xff] %vm299_vm1, %v270_v20 }
  0x38   : > { %281 = vrot.lane.b32.xlu1 %v254_v22, %s840_s11  ;;  %306 = vst.msk [vmem:[%s865_s13 + $0x30] sm:$0xff] %vm299_vm1, %v271_v21  ;;  %277 = vrot.lane.b32.xlu0 %v252_v24, %s840_s11 }
  0x39   : > { %307 = vst.msk [vmem:[%s865_s13 + $0x38] sm:$0xff] %vm299_vm1, %v272_v23  ;;  %285 = vrot.lane.b32.xlu2 %v256_v25, %s840_s11 }
  0x40   : > { %289 = vrot.lane.b32.xlu1 %v258_v26, %s840_s11  ;;  %287 = vrot.lane.b32.xlu0 %v257_v27, %s840_s11 }
  0x8b   : > { %v284_v28 = vpop.permute.xlu2 %283 }
  0x8c   : > { %v295_v29 = vsel %vm843_vm0, %v284_v28, 0.0 }
  0x8d   : > { %473 = vst.msk [vmem:[%s865_s13 + $0x60] sm:$0xff] %vm299_vm1, %v295_v29 }
  0x93   : > { %v286_v30 = vpop.permute.xlu2 %285 }
  0x94   : > { %v296_v31 = vsel %vm843_vm0, %v286_v30, 0.0 }
  0x95   : > { %474 = vst.msk [vmem:[%s865_s13 + $0x68] sm:$0xff] %vm299_vm1, %v296_v31 }
  0xa2   : > { %v280_v32 = vpop.permute.xlu1 %279  ;;  %v276_v34 = vpop.permute.xlu0 %275 }
  0xa3   : > { %v293_v33 = vsel %vm843_vm0, %v280_v32, 0.0  ;;  %v291_v35 = vsel %vm843_vm0, %v276_v34, 0.0 }
  0xa4   : > { %471 = vst.msk [vmem:[%s865_s13 + $0x50] sm:$0xff] %vm299_vm1, %v293_v33 }
  0xa5   : > { %469 = vst.msk [vmem:[%s865_s13 + $0x40] sm:$0xff] %vm299_vm1, %v291_v35 }
  0xaa   : > { %v282_v36 = vpop.permute.xlu1 %281  ;;  %v278_v38 = vpop.permute.xlu0 %277 }
  0xab   : > { %v294_v37 = vsel %vm843_vm0, %v282_v36, 0.0  ;;  %v292_v39 = vsel %vm843_vm0, %v278_v38, 0.0 }
  0xac   : > { %472 = vst.msk [vmem:[%s865_s13 + $0x58] sm:$0xff] %vm299_vm1, %v294_v37 }
  0xad   : > { %470 = vst.msk [vmem:[%s865_s13 + $0x48] sm:$0xff] %vm299_vm1, %v292_v39 }
  0xb2   : > { %v290_v40 = vpop.permute.xlu1 %289  ;;  %v288_v42 = vpop.permute.xlu0 %287 }
  0xb3   : > { %v298_v41 = vsel %vm843_vm0, %v290_v40, 0.0  ;;  %v297_v43 = vsel %vm843_vm0, %v288_v42, 0.0 }
  0xb4   : > { %476 = vst.msk [vmem:[%s865_s13 + $0x78] sm:$0xff] %vm299_vm1, %v298_v41 }
  0xb5   : > { %475 = vst.msk [vmem:[%s865_s13 + $0x70] sm:$0xff] %vm299_vm1, %v297_v43 }
  0xb6   : > { %643 = shalt.err (!%p640_p13)
}
  0xb7   : > { %s706_s8 = smov 128   ;;  %s707_s4 = smov 8  }
  0xb8   : > { %489 = dma.vmem_to_hbm [thread:$0]  (%p782_p9), %s335_s17, 2048, %s337_s5, %s318_s23, %s706_s8, %s706_s8, %s707_s4  }
  0xb9 PF: > { %s351_s11 = sand.u32 1, %s682_s14   ;;  %p499_p0 = pnand %p458_p12, %p789_p11 }
  0xba   : > { %s352_s25 = scalar_lea.sflag [#allocation6], %s351_s11 }
  0xbb   : > { %p500_p1 = pneg %p499_p0 }
  0xbd   : > { %677 = dma.done.wait (%p500_p1), %s352_s25, 2048  }
  0xbe   : > { %679 = vsyncadd (%p500_p1), %s352_s25, 4294965248  ;;  %s23_s19 = sadd.s32 1, %s702_s19   ;;  %s985_s14 = smov %s686_s15 }
  0xbf   : > { %p20_p2 = scmp.ge.s32.totalorder %s23_s19, 4   ;;  %s986_s15 = smov %s690_s16 }
  0xc0   : > { %s987_s16 = smov %s787_s27  ;;  %s988_s17 = smov %s698_s18 }
  0xc1   : > { %s989_s18 = smov %s991_s21  ;;  %22 = sbr.rel (!%p20_p2) target bundleno = 10 (0xa), region = 87 }
  0xc6   :  { %358 = vsyncpa [#allocation5], 1 }
  0xc7   :  { %360 = vsyncpa [#allocation5 + $0x1], 1 }
  0xc8   :  { %361 = vsyncpa [#allocation8], 1 }
  0xc9   :  { %363 = vsyncpa [#allocation8 + $0x1], 1 }
  0xca   :  { %364 = vsyncpa [#allocation6], 1 }
  0xcb   :  { %366 = vsyncpa [#allocation6 + $0x1], 1 }

</bundles_post_ra>
